<compile_context>
chip_gen: v5e
topology: v5e:2x2
jax: 0.10.0
libtpu: 0.0.40
codegen_flags: <defaults>
</compile_context>

<pallas_src>
import jax
import jax.numpy as jnp
from jax.experimental import pallas as pl
from jax.experimental.pallas import tpu as pltpu

# ---------------- model dimensions (small, consistent with the module) ------
VOCAB = 50      # len(unique_words) -- synthetic
EMBED = 20      # embedding dim
HIDDEN = 16     # LSTM hidden size
FC1 = 256
OUT = 2
BATCH = 8       # fills all 8 sublanes of a vreg; kernel is batch-generic
SEQ = 8


def lstm_head_kernel(tok_ref,    # VMEM (T*TB, 1) int32  time-major token column
                     proj_ref,   # VMEM (V, 4H)  f32     Embedding @ W_ih.T + b
                     whh_ref,    # VMEM (H, 4H)  bf16    W_hh.T (gate order i,f,g,o)
                     w1_ref,     # VMEM (H, FC1) bf16    fc1.weight.T
                     b1_ref,     # VMEM (1, FC1) f32
                     w2_ref,     # VMEM (FC1, OUT) bf16
                     b2_ref,     # VMEM (1, OUT) f32
                     out_ref):   # VMEM (TB, OUT) f32
    TB = out_ref.shape[0]
    TTB = tok_ref.shape[0]
    T = TTB // TB
    H = whh_ref.shape[0]
    V, G = proj_ref.shape                                # G = 4H

    # ---- Phase 1: one-hot MXU "gather" of embedding + input projection.
    # onehot (T*TB, V) @ proj (V, 4H) -> xp (T*TB, 4H), time-major rows.
    # One VPU compare + one small MXU pass replaces 64 serialized scalar
    # reads / dynamic sublane loads / masked sub-vreg stores.
    tok_col = tok_ref[...]                               # (T*TB, 1) int32
    vids = jax.lax.broadcasted_iota(jnp.int32, (TTB, V), 1)
    onehot = (vids == tok_col).astype(jnp.float32)       # exact 0/1; OOB id -> zero row
    xp = jnp.dot(onehot, proj_ref[...],
                 preferred_element_type=jnp.float32)     # (T*TB, 4H) f32, lives in vregs

    # ---- Phase 2: LSTM recurrence -- only h @ W_hh per step, fully unrolled.
    # bf16 MXU operands, f32 accumulation (single MXU pass on the serial chain).
    whh = whh_ref[...]                                   # (H, 4H) bf16, hoisted
    h = jnp.zeros((TB, H), jnp.float32)
    c = jnp.zeros((TB, H), jnp.float32)
    for t in range(T):                                   # static unroll, T = 8
        x_t = xp[t * TB:(t + 1) * TB, :]                 # static, sublane-aligned slice
        gates = x_t + jnp.dot(h.astype(jnp.bfloat16), whh,
                              preferred_element_type=jnp.float32)  # (TB, 4H)
        sg = jax.nn.sigmoid(gates)                       # full width: i, f, o in one pass
        tg = jnp.tanh(gates)                             # full width: g gate
        i_g = sg[:, 0 * H:1 * H]
        f_g = sg[:, 1 * H:2 * H]
        g_g = tg[:, 2 * H:3 * H]
        o_g = sg[:, 3 * H:4 * H]
        c = f_g * c + i_g * g_g
        h = o_g * jnp.tanh(c)                            # h == output[:, t, :]

    # ---- Phase 3: FC head on the last hidden state (bf16 MXU, f32 accum).
    z1 = jnp.dot(h.astype(jnp.bfloat16), w1_ref[...],
                 preferred_element_type=jnp.float32) + b1_ref[...]
    z1 = jnp.maximum(z1, 0.0)                            # ReLU
    z2 = jnp.dot(z1.astype(jnp.bfloat16), w2_ref[...],
                 preferred_element_type=jnp.float32) + b2_ref[...]
    out_ref[...] = jax.nn.sigmoid(z2)


def net_forward(tokens, params, *, batch_tile=None):
    """tokens: (B, T) int32 token ids in [0, VOCAB). Returns (B, OUT) f32.

    batch_tile=None -> one big grid step (best on v5e/v6e and small batches).
    For large batches on v7x, pass batch_tile=B//2 (multiple of 8) to shard
    the "parallel" grid axis across the two TensorCores.
    """
    B, T = tokens.shape
    TB = B if batch_tile is None else batch_tile
    assert B % TB == 0, "batch must be divisible by batch_tile"
    assert TB == B or TB % 8 == 0, "batch_tile should be a multiple of 8"
    nt = B // TB

    # Layout plumbing (wrapper side): per-tile, time-major flattened token
    # column -> (nt * T * TB, 1) int32.  Tiny; keeps the kernel free of
    # transposes/reshapes.
    tok_tm = (tokens.astype(jnp.int32)
              .reshape(nt, TB, T)
              .transpose(0, 2, 1)           # (nt, T, TB)  time-major per tile
              .reshape(nt * T * TB, 1))

    V, G = params["proj"].shape             # (VOCAB, 4H)
    H = params["w_hh_t"].shape[0]
    F1 = params["w1_t"].shape[1]
    O = params["w2_t"].shape[1]

    grid_spec = pltpu.PrefetchScalarGridSpec(
        num_scalar_prefetch=0,
        grid=(nt,),
        in_specs=[
            pl.BlockSpec((T * TB, 1), lambda i: (i, 0)),    # time-major tokens
            pl.BlockSpec((V, G), lambda i: (0, 0)),         # proj table (f32)
            pl.BlockSpec((H, G), lambda i: (0, 0)),         # W_hh.T (bf16)
            pl.BlockSpec((H, F1), lambda i: (0, 0)),        # fc1.weight.T (bf16)
            pl.BlockSpec((1, F1), lambda i: (0, 0)),        # fc1.bias
            pl.BlockSpec((F1, O), lambda i: (0, 0)),        # fc2.weight.T (bf16)
            pl.BlockSpec((1, O), lambda i: (0, 0)),         # fc2.bias
        ],
        out_specs=pl.BlockSpec((TB, O), lambda i: (i, 0)),
    )

    return pl.pallas_call(
        lstm_head_kernel,
        out_shape=jax.ShapeDtypeStruct((B, O), jnp.float32),
        grid_spec=grid_spec,
        compiler_params=pltpu.CompilerParams(
            dimension_semantics=("parallel",)),   # batch tiles -> 2 TCs on v7x
    )(tok_tm, params["proj"], params["w_hh_t"], params["w1_t"],
      params["b1"], params["w2_t"], params["b2"])


# ---------------------------- parameters ------------------------------------
def init_raw_params(key):
    """Deterministic synthetic parameters with the exact PyTorch shapes."""
    ks = jax.random.split(key, 9)

    def u(k, shape, bound):
        return jax.random.uniform(k, shape, jnp.float32, -bound, bound)

    H = HIDDEN
    bound = 1.0 / jnp.sqrt(H)
    return {
        "embedding": jax.random.normal(ks[0], (VOCAB, EMBED), jnp.float32),
        "w_ih": u(ks[1], (4 * H, EMBED), bound),   # gate order i,f,g,o
        "w_hh": u(ks[2], (4 * H, H), bound),
        "b_ih": u(ks[3], (4 * H,), bound),
        "b_hh": u(ks[4], (4 * H,), bound),
        "w1": u(ks[5], (FC1, H), bound),
        "b1": u(ks[6], (FC1,), bound),
        "w2": u(ks[7], (OUT, FC1), 1.0 / jnp.sqrt(FC1)),
        "b2": u(ks[8], (OUT,), 1.0 / jnp.sqrt(FC1)),
    }


def pack_params(raw):
    """One-time (parameter-only) repack: fold embedding + W_ih + biases into a
    one-hot-matmul table, pre-transpose weights, cast MXU-only operands to
    bf16 (f32 accumulation in-kernel)."""
    proj = raw["embedding"] @ raw["w_ih"].T + (raw["b_ih"] + raw["b_hh"])  # (V, 4H)
    return {
        "proj": proj.astype(jnp.float32),                 # stays f32 (exact table)
        "w_hh_t": raw["w_hh"].T.astype(jnp.bfloat16),     # bf16 MXU operand
        "w1_t": raw["w1"].T.astype(jnp.bfloat16),
        "b1": raw["b1"].reshape(1, FC1).astype(jnp.float32),
        "w2_t": raw["w2"].T.astype(jnp.bfloat16),
        "b2": raw["b2"].reshape(1, OUT).astype(jnp.float32),
    }


# ---------------------------- pure-JAX reference ----------------------------
def reference_forward(tokens, raw):
    H = HIDDEN
    emb = raw["embedding"][tokens]                          # (B, T, E)
    b = raw["b_ih"] + raw["b_hh"]
    B, T = tokens.shape
    h = jnp.zeros((B, H), jnp.float32)
    c = jnp.zeros((B, H), jnp.float32)
    for t in range(T):
        g = emb[:, t, :] @ raw["w_ih"].T + h @ raw["w_hh"].T + b
        i = jax.nn.sigmoid(g[:, 0 * H:1 * H])
        f = jax.nn.sigmoid(g[:, 1 * H:2 * H])
        gg = jnp.tanh(g[:, 2 * H:3 * H])
        o = jax.nn.sigmoid(g[:, 3 * H:4 * H])
        c = f * c + i * gg
        h = o * jnp.tanh(c)
    z1 = jnp.maximum(h @ raw["w1"].T + raw["b1"], 0.0)
    z2 = z1 @ raw["w2"].T + raw["b2"]
    return jax.nn.sigmoid(z2)


if __name__ == "__main__":
    key = jax.random.PRNGKey(0)
    pkey, tkey = jax.random.split(key)

    raw = init_raw_params(pkey)
    params = pack_params(raw)
    tokens = jax.random.randint(tkey, (BATCH, SEQ), 0, VOCAB, dtype=jnp.int32)

    out = net_forward(tokens, params)
    out = jax.block_until_ready(out)

    assert out.shape == (BATCH, OUT)
    assert out.dtype == jnp.float32
    assert bool(jnp.all((out >= 0.0) & (out <= 1.0)))

    ref = jax.block_until_ready(reference_forward(tokens, raw))
    max_err = float(jnp.max(jnp.abs(out - ref)))
    assert max_err < 5e-2, f"mismatch vs reference: {max_err}"

    print("KERNEL_OK")
</pallas_src>

<mosaic_0001>
module attributes {stable_mosaic.version = 11 : i64} {
  func.func @lstm_head_kernel(%arg0: i32, %arg1: memref<64x1xi32, #tpu.memory_space<vmem>>, %arg2: memref<50x64xf32, #tpu.memory_space<vmem>>, %arg3: memref<16x64xbf16, #tpu.memory_space<vmem>>, %arg4: memref<16x256xbf16, #tpu.memory_space<vmem>>, %arg5: memref<1x256xf32, #tpu.memory_space<vmem>>, %arg6: memref<256x2xbf16, #tpu.memory_space<vmem>>, %arg7: memref<1x2xf32, #tpu.memory_space<vmem>>, %arg8: memref<8x2xf32, #tpu.memory_space<vmem>>) attributes {dimension_semantics = [#tpu.dimension_semantics<parallel>], iteration_bounds = array<i64: 1>, scalar_prefetch = 0 : i64, scratch_operands = 0 : i64, tpu.core_type = #tpu.core_type<tc>, window_params = [{transform_indices = @transform_0, window_bounds = array<i64: 64, 1>}, {pipeline_mode = #tpu.pipeline_mode<synchronous>, transform_indices = @transform_1, window_bounds = array<i64: 50, 64>}, {pipeline_mode = #tpu.pipeline_mode<synchronous>, transform_indices = @transform_2, window_bounds = array<i64: 16, 64>}, {pipeline_mode = #tpu.pipeline_mode<synchronous>, transform_indices = @transform_3, window_bounds = array<i64: 16, 256>}, {pipeline_mode = #tpu.pipeline_mode<synchronous>, transform_indices = @transform_4, window_bounds = array<i64: 1, 256>}, {pipeline_mode = #tpu.pipeline_mode<synchronous>, transform_indices = @transform_5, window_bounds = array<i64: 256, 2>}, {pipeline_mode = #tpu.pipeline_mode<synchronous>, transform_indices = @transform_6, window_bounds = array<i64: 1, 2>}, {transform_indices = @transform_7, window_bounds = array<i64: 8, 2>}]} {
    %c0 = arith.constant 0 : index
    %c0_0 = arith.constant 0 : index
    %0 = vector.load %arg1[%c0, %c0_0] : memref<64x1xi32, #tpu.memory_space<vmem>>, vector<64x1xi32>
    %1 = tpu.iota {dimensions = array<i32: 1>} : vector<64x50xi32>
    %2 = vector.broadcast %0 : vector<64x1xi32> to vector<64x50xi32>
    %3 = arith.cmpi eq, %1, %2 : vector<64x50xi32>
    %4 = arith.extui %3 : vector<64x50xi1> to vector<64x50xi32>
    %5 = arith.sitofp %4 : vector<64x50xi32> to vector<64x50xf32>
    %c0_1 = arith.constant 0 : index
    %c0_2 = arith.constant 0 : index
    %6 = vector.load %arg2[%c0_1, %c0_2] : memref<50x64xf32, #tpu.memory_space<vmem>>, vector<50x64xf32>
    %cst = arith.constant dense<0.000000e+00> : vector<64x64xf32>
    %7 = tpu.matmul %5, %6, %cst {dimension_numbers = #tpu.dot_dimension_numbers<[1], [0], [0], [1], [0, 0, 1, 1], [], []>} : vector<64x50xf32>, vector<50x64xf32>, vector<64x64xf32> -> vector<64x64xf32>
    %c0_3 = arith.constant 0 : index
    %c0_4 = arith.constant 0 : index
    %8 = vector.load %arg3[%c0_3, %c0_4] : memref<16x64xbf16, #tpu.memory_space<vmem>>, vector<16x64xbf16>
    %cst_5 = arith.constant 0.000000e+00 : f32
    %9 = vector.broadcast %cst_5 : f32 to vector<8x16xf32>
    %cst_6 = arith.constant 0.000000e+00 : f32
    %10 = vector.broadcast %cst_6 : f32 to vector<8x16xf32>
    %11 = vector.extract_strided_slice %7 {offsets = [0, 0], sizes = [8, 64], strides = [1, 1]} : vector<64x64xf32> to vector<8x64xf32>
    %12 = arith.truncf %9 : vector<8x16xf32> to vector<8x16xbf16>
    %cst_7 = arith.constant dense<0.000000e+00> : vector<8x64xf32>
    %13 = tpu.matmul %12, %8, %cst_7 {dimension_numbers = #tpu.dot_dimension_numbers<[1], [0], [0], [1], [0, 0, 1, 1], [], []>} : vector<8x16xbf16>, vector<16x64xbf16>, vector<8x64xf32> -> vector<8x64xf32>
    %14 = arith.addf %11, %13 : vector<8x64xf32>
    %15 = arith.negf %14 : vector<8x64xf32>
    %16 = math.exp %15 : vector<8x64xf32>
    %cst_8 = arith.constant 1.000000e+00 : f32
    %17 = vector.broadcast %cst_8 : f32 to vector<8x64xf32>
    %18 = arith.addf %17, %16 : vector<8x64xf32>
    %19 = arith.divf %17, %18 : vector<8x64xf32>
    %20 = math.tanh %14 : vector<8x64xf32>
    %21 = vector.extract_strided_slice %19 {offsets = [0, 0], sizes = [8, 16], strides = [1, 1]} : vector<8x64xf32> to vector<8x16xf32>
    %22 = vector.extract_strided_slice %19 {offsets = [0, 16], sizes = [8, 16], strides = [1, 1]} : vector<8x64xf32> to vector<8x16xf32>
    %23 = vector.extract_strided_slice %20 {offsets = [0, 32], sizes = [8, 16], strides = [1, 1]} : vector<8x64xf32> to vector<8x16xf32>
    %24 = vector.extract_strided_slice %19 {offsets = [0, 48], sizes = [8, 16], strides = [1, 1]} : vector<8x64xf32> to vector<8x16xf32>
    %25 = arith.mulf %22, %10 : vector<8x16xf32>
    %26 = arith.mulf %21, %23 : vector<8x16xf32>
    %27 = arith.addf %25, %26 : vector<8x16xf32>
    %28 = math.tanh %27 : vector<8x16xf32>
    %29 = arith.mulf %24, %28 : vector<8x16xf32>
    %30 = vector.extract_strided_slice %7 {offsets = [8, 0], sizes = [8, 64], strides = [1, 1]} : vector<64x64xf32> to vector<8x64xf32>
    %31 = arith.truncf %29 : vector<8x16xf32> to vector<8x16xbf16>
    %cst_9 = arith.constant dense<0.000000e+00> : vector<8x64xf32>
    %32 = tpu.matmul %31, %8, %cst_9 {dimension_numbers = #tpu.dot_dimension_numbers<[1], [0], [0], [1], [0, 0, 1, 1], [], []>} : vector<8x16xbf16>, vector<16x64xbf16>, vector<8x64xf32> -> vector<8x64xf32>
    %33 = arith.addf %30, %32 : vector<8x64xf32>
    %34 = arith.negf %33 : vector<8x64xf32>
    %35 = math.exp %34 : vector<8x64xf32>
    %cst_10 = arith.constant 1.000000e+00 : f32
    %36 = vector.broadcast %cst_10 : f32 to vector<8x64xf32>
    %37 = arith.addf %36, %35 : vector<8x64xf32>
    %38 = arith.divf %36, %37 : vector<8x64xf32>
    %39 = math.tanh %33 : vector<8x64xf32>
    %40 = vector.extract_strided_slice %38 {offsets = [0, 0], sizes = [8, 16], strides = [1, 1]} : vector<8x64xf32> to vector<8x16xf32>
    %41 = vector.extract_strided_slice %38 {offsets = [0, 16], sizes = [8, 16], strides = [1, 1]} : vector<8x64xf32> to vector<8x16xf32>
    %42 = vector.extract_strided_slice %39 {offsets = [0, 32], sizes = [8, 16], strides = [1, 1]} : vector<8x64xf32> to vector<8x16xf32>
    %43 = vector.extract_strided_slice %38 {offsets = [0, 48], sizes = [8, 16], strides = [1, 1]} : vector<8x64xf32> to vector<8x16xf32>
    %44 = arith.mulf %41, %27 : vector<8x16xf32>
    %45 = arith.mulf %40, %42 : vector<8x16xf32>
    %46 = arith.addf %44, %45 : vector<8x16xf32>
    %47 = math.tanh %46 : vector<8x16xf32>
    %48 = arith.mulf %43, %47 : vector<8x16xf32>
    %49 = vector.extract_strided_slice %7 {offsets = [16, 0], sizes = [8, 64], strides = [1, 1]} : vector<64x64xf32> to vector<8x64xf32>
    %50 = arith.truncf %48 : vector<8x16xf32> to vector<8x16xbf16>
    %cst_11 = arith.constant dense<0.000000e+00> : vector<8x64xf32>
    %51 = tpu.matmul %50, %8, %cst_11 {dimension_numbers = #tpu.dot_dimension_numbers<[1], [0], [0], [1], [0, 0, 1, 1], [], []>} : vector<8x16xbf16>, vector<16x64xbf16>, vector<8x64xf32> -> vector<8x64xf32>
    %52 = arith.addf %49, %51 : vector<8x64xf32>
    %53 = arith.negf %52 : vector<8x64xf32>
    %54 = math.exp %53 : vector<8x64xf32>
    %cst_12 = arith.constant 1.000000e+00 : f32
    %55 = vector.broadcast %cst_12 : f32 to vector<8x64xf32>
    %56 = arith.addf %55, %54 : vector<8x64xf32>
    %57 = arith.divf %55, %56 : vector<8x64xf32>
    %58 = math.tanh %52 : vector<8x64xf32>
    %59 = vector.extract_strided_slice %57 {offsets = [0, 0], sizes = [8, 16], strides = [1, 1]} : vector<8x64xf32> to vector<8x16xf32>
    %60 = vector.extract_strided_slice %57 {offsets = [0, 16], sizes = [8, 16], strides = [1, 1]} : vector<8x64xf32> to vector<8x16xf32>
    %61 = vector.extract_strided_slice %58 {offsets = [0, 32], sizes = [8, 16], strides = [1, 1]} : vector<8x64xf32> to vector<8x16xf32>
    %62 = vector.extract_strided_slice %57 {offsets = [0, 48], sizes = [8, 16], strides = [1, 1]} : vector<8x64xf32> to vector<8x16xf32>
    %63 = arith.mulf %60, %46 : vector<8x16xf32>
    %64 = arith.mulf %59, %61 : vector<8x16xf32>
    %65 = arith.addf %63, %64 : vector<8x16xf32>
    %66 = math.tanh %65 : vector<8x16xf32>
    %67 = arith.mulf %62, %66 : vector<8x16xf32>
    %68 = vector.extract_strided_slice %7 {offsets = [24, 0], sizes = [8, 64], strides = [1, 1]} : vector<64x64xf32> to vector<8x64xf32>
    %69 = arith.truncf %67 : vector<8x16xf32> to vector<8x16xbf16>
    %cst_13 = arith.constant dense<0.000000e+00> : vector<8x64xf32>
    %70 = tpu.matmul %69, %8, %cst_13 {dimension_numbers = #tpu.dot_dimension_numbers<[1], [0], [0], [1], [0, 0, 1, 1], [], []>} : vector<8x16xbf16>, vector<16x64xbf16>, vector<8x64xf32> -> vector<8x64xf32>
    %71 = arith.addf %68, %70 : vector<8x64xf32>
    %72 = arith.negf %71 : vector<8x64xf32>
    %73 = math.exp %72 : vector<8x64xf32>
    %cst_14 = arith.constant 1.000000e+00 : f32
    %74 = vector.broadcast %cst_14 : f32 to vector<8x64xf32>
    %75 = arith.addf %74, %73 : vector<8x64xf32>
    %76 = arith.divf %74, %75 : vector<8x64xf32>
    %77 = math.tanh %71 : vector<8x64xf32>
    %78 = vector.extract_strided_slice %76 {offsets = [0, 0], sizes = [8, 16], strides = [1, 1]} : vector<8x64xf32> to vector<8x16xf32>
    %79 = vector.extract_strided_slice %76 {offsets = [0, 16], sizes = [8, 16], strides = [1, 1]} : vector<8x64xf32> to vector<8x16xf32>
    %80 = vector.extract_strided_slice %77 {offsets = [0, 32], sizes = [8, 16], strides = [1, 1]} : vector<8x64xf32> to vector<8x16xf32>
    %81 = vector.extract_strided_slice %76 {offsets = [0, 48], sizes = [8, 16], strides = [1, 1]} : vector<8x64xf32> to vector<8x16xf32>
    %82 = arith.mulf %79, %65 : vector<8x16xf32>
    %83 = arith.mulf %78, %80 : vector<8x16xf32>
    %84 = arith.addf %82, %83 : vector<8x16xf32>
    %85 = math.tanh %84 : vector<8x16xf32>
    %86 = arith.mulf %81, %85 : vector<8x16xf32>
    %87 = vector.extract_strided_slice %7 {offsets = [32, 0], sizes = [8, 64], strides = [1, 1]} : vector<64x64xf32> to vector<8x64xf32>
    %88 = arith.truncf %86 : vector<8x16xf32> to vector<8x16xbf16>
    %cst_15 = arith.constant dense<0.000000e+00> : vector<8x64xf32>
    %89 = tpu.matmul %88, %8, %cst_15 {dimension_numbers = #tpu.dot_dimension_numbers<[1], [0], [0], [1], [0, 0, 1, 1], [], []>} : vector<8x16xbf16>, vector<16x64xbf16>, vector<8x64xf32> -> vector<8x64xf32>
    %90 = arith.addf %87, %89 : vector<8x64xf32>
    %91 = arith.negf %90 : vector<8x64xf32>
    %92 = math.exp %91 : vector<8x64xf32>
    %cst_16 = arith.constant 1.000000e+00 : f32
    %93 = vector.broadcast %cst_16 : f32 to vector<8x64xf32>
    %94 = arith.addf %93, %92 : vector<8x64xf32>
    %95 = arith.divf %93, %94 : vector<8x64xf32>
    %96 = math.tanh %90 : vector<8x64xf32>
    %97 = vector.extract_strided_slice %95 {offsets = [0, 0], sizes = [8, 16], strides = [1, 1]} : vector<8x64xf32> to vector<8x16xf32>
    %98 = vector.extract_strided_slice %95 {offsets = [0, 16], sizes = [8, 16], strides = [1, 1]} : vector<8x64xf32> to vector<8x16xf32>
    %99 = vector.extract_strided_slice %96 {offsets = [0, 32], sizes = [8, 16], strides = [1, 1]} : vector<8x64xf32> to vector<8x16xf32>
    %100 = vector.extract_strided_slice %95 {offsets = [0, 48], sizes = [8, 16], strides = [1, 1]} : vector<8x64xf32> to vector<8x16xf32>
    %101 = arith.mulf %98, %84 : vector<8x16xf32>
    %102 = arith.mulf %97, %99 : vector<8x16xf32>
    %103 = arith.addf %101, %102 : vector<8x16xf32>
    %104 = math.tanh %103 : vector<8x16xf32>
    %105 = arith.mulf %100, %104 : vector<8x16xf32>
    %106 = vector.extract_strided_slice %7 {offsets = [40, 0], sizes = [8, 64], strides = [1, 1]} : vector<64x64xf32> to vector<8x64xf32>
    %107 = arith.truncf %105 : vector<8x16xf32> to vector<8x16xbf16>
    %cst_17 = arith.constant dense<0.000000e+00> : vector<8x64xf32>
    %108 = tpu.matmul %107, %8, %cst_17 {dimension_numbers = #tpu.dot_dimension_numbers<[1], [0], [0], [1], [0, 0, 1, 1], [], []>} : vector<8x16xbf16>, vector<16x64xbf16>, vector<8x64xf32> -> vector<8x64xf32>
    %109 = arith.addf %106, %108 : vector<8x64xf32>
    %110 = arith.negf %109 : vector<8x64xf32>
    %111 = math.exp %110 : vector<8x64xf32>
    %cst_18 = arith.constant 1.000000e+00 : f32
    %112 = vector.broadcast %cst_18 : f32 to vector<8x64xf32>
    %113 = arith.addf %112, %111 : vector<8x64xf32>
    %114 = arith.divf %112, %113 : vector<8x64xf32>
    %115 = math.tanh %109 : vector<8x64xf32>
    %116 = vector.extract_strided_slice %114 {offsets = [0, 0], sizes = [8, 16], strides = [1, 1]} : vector<8x64xf32> to vector<8x16xf32>
    %117 = vector.extract_strided_slice %114 {offsets = [0, 16], sizes = [8, 16], strides = [1, 1]} : vector<8x64xf32> to vector<8x16xf32>
    %118 = vector.extract_strided_slice %115 {offsets = [0, 32], sizes = [8, 16], strides = [1, 1]} : vector<8x64xf32> to vector<8x16xf32>
    %119 = vector.extract_strided_slice %114 {offsets = [0, 48], sizes = [8, 16], strides = [1, 1]} : vector<8x64xf32> to vector<8x16xf32>
    %120 = arith.mulf %117, %103 : vector<8x16xf32>
    %121 = arith.mulf %116, %118 : vector<8x16xf32>
    %122 = arith.addf %120, %121 : vector<8x16xf32>
    %123 = math.tanh %122 : vector<8x16xf32>
    %124 = arith.mulf %119, %123 : vector<8x16xf32>
    %125 = vector.extract_strided_slice %7 {offsets = [48, 0], sizes = [8, 64], strides = [1, 1]} : vector<64x64xf32> to vector<8x64xf32>
    %126 = arith.truncf %124 : vector<8x16xf32> to vector<8x16xbf16>
    %cst_19 = arith.constant dense<0.000000e+00> : vector<8x64xf32>
    %127 = tpu.matmul %126, %8, %cst_19 {dimension_numbers = #tpu.dot_dimension_numbers<[1], [0], [0], [1], [0, 0, 1, 1], [], []>} : vector<8x16xbf16>, vector<16x64xbf16>, vector<8x64xf32> -> vector<8x64xf32>
    %128 = arith.addf %125, %127 : vector<8x64xf32>
    %129 = arith.negf %128 : vector<8x64xf32>
    %130 = math.exp %129 : vector<8x64xf32>
    %cst_20 = arith.constant 1.000000e+00 : f32
    %131 = vector.broadcast %cst_20 : f32 to vector<8x64xf32>
    %132 = arith.addf %131, %130 : vector<8x64xf32>
    %133 = arith.divf %131, %132 : vector<8x64xf32>
    %134 = math.tanh %128 : vector<8x64xf32>
    %135 = vector.extract_strided_slice %133 {offsets = [0, 0], sizes = [8, 16], strides = [1, 1]} : vector<8x64xf32> to vector<8x16xf32>
    %136 = vector.extract_strided_slice %133 {offsets = [0, 16], sizes = [8, 16], strides = [1, 1]} : vector<8x64xf32> to vector<8x16xf32>
    %137 = vector.extract_strided_slice %134 {offsets = [0, 32], sizes = [8, 16], strides = [1, 1]} : vector<8x64xf32> to vector<8x16xf32>
    %138 = vector.extract_strided_slice %133 {offsets = [0, 48], sizes = [8, 16], strides = [1, 1]} : vector<8x64xf32> to vector<8x16xf32>
    %139 = arith.mulf %136, %122 : vector<8x16xf32>
    %140 = arith.mulf %135, %137 : vector<8x16xf32>
    %141 = arith.addf %139, %140 : vector<8x16xf32>
    %142 = math.tanh %141 : vector<8x16xf32>
    %143 = arith.mulf %138, %142 : vector<8x16xf32>
    %144 = vector.extract_strided_slice %7 {offsets = [56, 0], sizes = [8, 64], strides = [1, 1]} : vector<64x64xf32> to vector<8x64xf32>
    %145 = arith.truncf %143 : vector<8x16xf32> to vector<8x16xbf16>
    %cst_21 = arith.constant dense<0.000000e+00> : vector<8x64xf32>
    %146 = tpu.matmul %145, %8, %cst_21 {dimension_numbers = #tpu.dot_dimension_numbers<[1], [0], [0], [1], [0, 0, 1, 1], [], []>} : vector<8x16xbf16>, vector<16x64xbf16>, vector<8x64xf32> -> vector<8x64xf32>
    %147 = arith.addf %144, %146 : vector<8x64xf32>
    %148 = arith.negf %147 : vector<8x64xf32>
    %149 = math.exp %148 : vector<8x64xf32>
    %cst_22 = arith.constant 1.000000e+00 : f32
    %150 = vector.broadcast %cst_22 : f32 to vector<8x64xf32>
    %151 = arith.addf %150, %149 : vector<8x64xf32>
    %152 = arith.divf %150, %151 : vector<8x64xf32>
    %153 = math.tanh %147 : vector<8x64xf32>
    %154 = vector.extract_strided_slice %152 {offsets = [0, 0], sizes = [8, 16], strides = [1, 1]} : vector<8x64xf32> to vector<8x16xf32>
    %155 = vector.extract_strided_slice %152 {offsets = [0, 16], sizes = [8, 16], strides = [1, 1]} : vector<8x64xf32> to vector<8x16xf32>
    %156 = vector.extract_strided_slice %153 {offsets = [0, 32], sizes = [8, 16], strides = [1, 1]} : vector<8x64xf32> to vector<8x16xf32>
    %157 = vector.extract_strided_slice %152 {offsets = [0, 48], sizes = [8, 16], strides = [1, 1]} : vector<8x64xf32> to vector<8x16xf32>
    %158 = arith.mulf %155, %141 : vector<8x16xf32>
    %159 = arith.mulf %154, %156 : vector<8x16xf32>
    %160 = arith.addf %158, %159 : vector<8x16xf32>
    %161 = math.tanh %160 : vector<8x16xf32>
    %162 = arith.mulf %157, %161 : vector<8x16xf32>
    %163 = arith.truncf %162 : vector<8x16xf32> to vector<8x16xbf16>
    %c0_23 = arith.constant 0 : index
    %c0_24 = arith.constant 0 : index
    %164 = vector.load %arg4[%c0_23, %c0_24] : memref<16x256xbf16, #tpu.memory_space<vmem>>, vector<16x256xbf16>
    %cst_25 = arith.constant dense<0.000000e+00> : vector<8x256xf32>
    %165 = tpu.matmul %163, %164, %cst_25 {dimension_numbers = #tpu.dot_dimension_numbers<[1], [0], [0], [1], [0, 0, 1, 1], [], []>} : vector<8x16xbf16>, vector<16x256xbf16>, vector<8x256xf32> -> vector<8x256xf32>
    %c0_26 = arith.constant 0 : index
    %c0_27 = arith.constant 0 : index
    %166 = vector.load %arg5[%c0_26, %c0_27] : memref<1x256xf32, #tpu.memory_space<vmem>>, vector<1x256xf32>
    %167 = vector.broadcast %166 : vector<1x256xf32> to vector<8x256xf32>
    %168 = arith.addf %165, %167 : vector<8x256xf32>
    %cst_28 = arith.constant 0.000000e+00 : f32
    %169 = vector.broadcast %cst_28 : f32 to vector<8x256xf32>
    %170 = arith.maximumf %168, %169 : vector<8x256xf32>
    %171 = arith.truncf %170 : vector<8x256xf32> to vector<8x256xbf16>
    %c0_29 = arith.constant 0 : index
    %c0_30 = arith.constant 0 : index
    %172 = vector.load %arg6[%c0_29, %c0_30] : memref<256x2xbf16, #tpu.memory_space<vmem>>, vector<256x2xbf16>
    %cst_31 = arith.constant dense<0.000000e+00> : vector<8x2xf32>
    %173 = tpu.matmul %171, %172, %cst_31 {dimension_numbers = #tpu.dot_dimension_numbers<[1], [0], [0], [1], [0, 0, 1, 1], [], []>} : vector<8x256xbf16>, vector<256x2xbf16>, vector<8x2xf32> -> vector<8x2xf32>
    %c0_32 = arith.constant 0 : index
    %c0_33 = arith.constant 0 : index
    %174 = vector.load %arg7[%c0_32, %c0_33] : memref<1x2xf32, #tpu.memory_space<vmem>>, vector<1x2xf32>
    %175 = vector.broadcast %174 : vector<1x2xf32> to vector<8x2xf32>
    %176 = arith.addf %173, %175 : vector<8x2xf32>
    %177 = arith.negf %176 : vector<8x2xf32>
    %178 = math.exp %177 : vector<8x2xf32>
    %cst_34 = arith.constant 1.000000e+00 : f32
    %179 = vector.broadcast %cst_34 : f32 to vector<8x2xf32>
    %180 = arith.addf %179, %178 : vector<8x2xf32>
    %181 = arith.divf %179, %180 : vector<8x2xf32>
    %c0_35 = arith.constant 0 : index
    %c0_36 = arith.constant 0 : index
    %182 = vector.load %arg8[%c0_35, %c0_36] : memref<8x2xf32, #tpu.memory_space<vmem>>, vector<8x2xf32>
    tpu.vector_store %arg8[%c0_35, %c0_36], %181 {strides = array<i32>} : memref<8x2xf32, #tpu.memory_space<vmem>>, vector<8x2xf32>,
    return
  }
  func.func @transform_0(%arg0: i32) -> (i32, i32) {
    %c0_i32 = arith.constant 0 : i32
    %c0_i32_0 = arith.constant 0 : i32
    return %arg0, %c0_i32 : i32, i32
  }
  func.func @transform_1(%arg0: i32) -> (i32, i32) {
    %c0_i32 = arith.constant 0 : i32
    %c0_i32_0 = arith.constant 0 : i32
    %c0_i32_1 = arith.constant 0 : i32
    return %c0_i32, %c0_i32_0 : i32, i32
  }
  func.func @transform_2(%arg0: i32) -> (i32, i32) {
    %c0_i32 = arith.constant 0 : i32
    %c0_i32_0 = arith.constant 0 : i32
    %c0_i32_1 = arith.constant 0 : i32
    return %c0_i32, %c0_i32_0 : i32, i32
  }
  func.func @transform_3(%arg0: i32) -> (i32, i32) {
    %c0_i32 = arith.constant 0 : i32
    %c0_i32_0 = arith.constant 0 : i32
    %c0_i32_1 = arith.constant 0 : i32
    return %c0_i32, %c0_i32_0 : i32, i32
  }
  func.func @transform_4(%arg0: i32) -> (i32, i32) {
    %c0_i32 = arith.constant 0 : i32
    %c0_i32_0 = arith.constant 0 : i32
    %c0_i32_1 = arith.constant 0 : i32
    return %c0_i32, %c0_i32_0 : i32, i32
  }
  func.func @transform_5(%arg0: i32) -> (i32, i32) {
    %c0_i32 = arith.constant 0 : i32
    %c0_i32_0 = arith.constant 0 : i32
    %c0_i32_1 = arith.constant 0 : i32
    return %c0_i32, %c0_i32_0 : i32, i32
  }
  func.func @transform_6(%arg0: i32) -> (i32, i32) {
    %c0_i32 = arith.constant 0 : i32
    %c0_i32_0 = arith.constant 0 : i32
    %c0_i32_1 = arith.constant 0 : i32
    return %c0_i32, %c0_i32_0 : i32, i32
  }
  func.func @transform_7(%arg0: i32) -> (i32, i32) {
    %c0_i32 = arith.constant 0 : i32
    %c0_i32_0 = arith.constant 0 : i32
    return %arg0, %c0_i32 : i32, i32
  }
}

</mosaic_0001>

<bundles_post_ra>
// kernel: tpu_custom_call.1
= control target key start
LH: loop header
LB: loop body
LE: loop exit
PB: predicated region body
PF: predicated region fallthrough
CT: control target
= control target key end

     0   :  { %vm117_vm0 = vcmask 1041408   ;;  %v1077_v0 = vmov 0   ;;  %v35_v10 = vlaneseq  ;;  %vm92_vm1 = vcmask 408576   ;;  %s1080_s18 = smov 16   ;;  %s1081_s19 = smov 32   ;;  %s1317_s0 = inlined_call_operand.vmem [shape: s32[64,1], index: 0, kind: input, shape index: {}]   ;;  %s1318_s1 = inlined_call_operand.vmem [shape: f32[50,64], index: 1, kind: input, shape index: {}]   ;;  %s1319_s2 = inlined_call_operand.vmem [shape: bf16[16,64], index: 2, kind: input, shape index: {}]   ;;  %s1320_s3 = inlined_call_operand.vmem [shape: bf16[16,256], index: 3, kind: input, shape index: {}]   ;;  %s1321_s5 = inlined_call_operand.vmem [shape: bf16[256,2], index: 5, kind: input, shape index: {}]   ;;  %s1322_s4 = inlined_call_operand.vmem [shape: f32[1,256], index: 4, kind: input, shape index: {}]   ;;  %s1323_s6 = inlined_call_operand.vmem [shape: f32[1,2], index: 6, kind: input, shape index: {}]   ;;  %s1324_s7 = inlined_call_operand.vmem [shape: f32[8,2], index: 7, kind: output, shape index: {}]  }
   0x1   :  { %1005 = vset.pattern.permute.xlu0 %v1077_v0  ;;  %v27_v1 = vld [vmem:[%s1317_s0] sm:$0xff]  ;;  %v91_v2 = vld [vmem:[%s1318_s1 + $0x30] sm:$0x3]  ;;  %v90_v3 = vld [vmem:[%s1318_s1 + $0x28] sm:$0xff]  ;;  %1006 = vset.pattern.permute.xlu2 %v1077_v0  ;;  %v1078_v13 = vmov 0.0   ;;  %s1082_s20 = smov 80  }
   0x2   :  { %38 = vperm.xlu0 %1005, %v27_v1   ;;  %877 = vmatpush.msk.msra.mxu0 %vm117_vm0, %v91_v2  ;;  %v1135_v4 = vld [vmem:[%s1319_s2] sm:$0xff]  ;;  %v88_v6 = vld [vmem:[%s1318_s1 + $0x18] sm:$0xff]  ;;  %v87_v7 = vld [vmem:[%s1318_s1 + $0x10] sm:$0xff]  ;;  %v1159_v11 = vand.u32 127, %v35_v10  ;;  %vm170_vm7 = vcmask 130048  }
   0x3   :  { %v89_v5 = vld [vmem:[%s1318_s1 + $0x20] sm:$0xff]  ;;  %1007 = vset.pattern.permute.xlu1 %v1077_v0  ;;  %181 = vmatpush.bf16.msra.mxu1 %v1135_v4  ;;  %v86_v8 = vld [vmem:[%s1318_s1 + $0x8] sm:$0xff] }
   0x4   :  { %131 = vmatpush.msra.mxu0 %v90_v3  ;;  %239 = vmatpush.bf16.msra.mxu2 %v1135_v4  ;;  %v85_v9 = vld [vmem:[%s1318_s1] sm:$0xff]  ;;  %s1079_s1 = smov 96   ;;  %v28_v42 = vld [vmem:[%s1317_s0 + $0x8] sm:$0xff] }
   0x5   :  { %297 = vmatpush.bf16.msra.mxu3 %v1135_v4 }
   0x6   :  { %132 = vmatpush.msra.mxu0 %v89_v5  ;;  %182 = vmatmul.bf16.vlgmr.msra.gmra.mxu1 %v1077_v0 }
   0x7   :  { %355 = vmatpush.bf16.msrb.mxu1 %v1135_v4 }
   0x8   :  { %413 = vmatpush.bf16.msrb.mxu2 %v1135_v4  ;;  %133 = vmatpush.msra.mxu0 %v88_v6  ;;  %v29_v6 = vld [vmem:[%s1317_s0 + $0x10] sm:$0xff] }
   0x9   :  { %471 = vmatpush.bf16.msrb.mxu3 %v1135_v4 }
   0xa   :  { %134 = vmatpush.msra.mxu0 %v87_v7 }
   0xb   :  { %529 = vmatpush.bf16.msra.mxu1 %v1135_v4 }
   0xc   :  { %135 = vmatpush.msra.mxu0 %v86_v8 }
   0xe   :  { %136 = vmatpush.msra.mxu0 %v85_v9 }
  0x74   :  { %v39_v12 = vpop.permute.xlu0 %38 }
  0x75   :  { %vm61_vm2 = vcmp.eq.s32.totalorder %v1159_v11, %v39_v12 }
  0x76   :  { %v869_v14 = vsel %vm61_vm2, 1.0, %v1078_v13 }
  0x77   :  { %878 = vmatmul.msk.f32.vlgmr.msra.gmra.mxu0 %vm92_vm1, %v869_v14 }
  0x83   :  { %v183_v15 = vpop.f32.mrf.mxu1 }
  0x8b   :  { %v185_v16 = vpop.f32.mrf.mxu1 }
  0xf4   :  { %v138_v17 = vpop.f32.mrf.mxu0 }
  0xf5   :  { %v187_v18 = vadd.f32 %v183_v15, %v138_v17 }
  0xf7   :  { %1009 = vtanh.f32 %v187_v18  ;;  %v890_v20 = vmul.f32 -1.442695, %v187_v18 }
  0xf9   :  { %1011 = vpow2.f32 %v890_v20  ;;  %v30_v20 = vld [vmem:[%s1317_s0 + $0x18] sm:$0xff] }
  0xfd   :  { %v1010_v19 = vpop.eup %1009 }
  0xfe   :  { %210 = vrot.lane.b32.xlu0 %v1010_v19, %s1079_s1 }
  0xff   :  { %v1012_v21 = vpop.eup %1011 }
 0x100   :  { %v191_v22 = vadd.f32 1.0, %v1012_v21 }
 0x102   :  { %1013 = vrcp.f32 %v191_v22  ;;  %v203_v28 = vand.u32 2147483648, %v191_v22  ;;  %vm197_vm4 = vweird.f32 %v191_v22  ;;  %v201_v29 = vand.u32 2147483647, %v191_v22 }
 0x104   :  { %v204_v31 = vor.u32 1.1754944e-38, %v203_v28  ;;  %vm202_vm6 = vcmp.eq.f32.partialorder %v201_v29, 8.507059e+37 }
 0x108   :  { %v1014_v23 = vpop.eup %1013 }
 0x109   :  { %v193_v24 = vmul.f32 %v1014_v23, %v191_v22  ;;  %vm198_vm3 = vweird.f32 %v1014_v23 }
 0x10a   :  { %vm199_vm5 = vmor %vm197_vm4, %vm198_vm3 }
 0x10b   :  { %v194_v25 = vsub.f32 1.0, %v193_v24 }
 0x10d   :  { %v195_v26 = vmul.f32 %v1014_v23, %v194_v25 }
 0x10f   :  { %v196_v27 = vadd.f32 %v1014_v23, %v195_v26 }
 0x111   :  { %v200_v30 = vsel %vm199_vm5, %v1014_v23, %v196_v27 }
 0x112   :  { %v205_v33 = vsel %vm202_vm6, %v204_v31, %v200_v30 }
 0x113   :  { %v208_v35 = vmul.f32 0.0, %v205_v33 }
 0x170   :  { %v211_v32 = vpop.permute.xlu0 %210 }
 0x171   :  { %v213_v34 = vmul.f32 %v211_v32, %v205_v33 }
 0x173   :  { %215 = vrot.lane.b32.xlu1 %v213_v34, %s1080_s18 }
 0x1e5   :  { %v216_v36 = vpop.permute.xlu1 %215 }
 0x1e6   :  { %v218_v37 = vadd.f32 %v216_v36, %v208_v35 }
 0x1e8   :  { %1015 = vtanh.f32 %v218_v37 }
 0x1ee   :  { %v1016_v38 = vpop.eup %1015 }
 0x1ef   :  { %221 = vrot.lane.b32.xlu1 %v1016_v38, %s1081_s19 }
 0x261   :  { %v222_v39 = vpop.permute.xlu1 %221 }
 0x262   :  { %v224_v40 = vmul.f32 %v222_v39, %v205_v33 }
 0x264   :  { %v225_v41 = vpack.c.bf16 %v224_v40, %v224_v40 }
 0x266   :  { %227 = vrot.lane.b32.xlu2 %v225_v41, %s1082_s20 }
 0x26e   :  { %41 = vperm.xlu2 %1006, %v28_v42  }
 0x2c0   :  { %v228_v43 = vpop.permute.xlu2 %227 }
 0x2c1   :  { %891 = vmatmul.msk.bf16.vlgmr.msra.gmra.mxu2 %vm170_vm7, %v228_v43 }
 0x2c2   :  { %587 = vmatpush.bf16.msra.mxu2 %v1135_v4 }
 0x2c8   :  { %v42_v44 = vpop.permute.xlu2 %41 }
 0x2c9   :  { %vm62_vm8 = vcmp.eq.s32.totalorder %v1159_v11, %v42_v44 }
 0x2ca   :  { %v870_v45 = vsel %vm62_vm8, 1.0, %v1078_v13 }
 0x2cb   :  { %879 = vmatmul.msk.f32.gmra.mxu0 %vm92_vm1, %v870_v45 }
 0x344   :  { %v241_v46 = vpop.f32.mrf.mxu2 }
 0x348   :  { %v141_v47 = vpop.f32.mrf.mxu0 }
 0x349   :  { %v245_v48 = vadd.f32 %v241_v46, %v141_v47 }
 0x34b   :  { %1017 = vtanh.f32 %v245_v48  ;;  %v892_v51 = vmul.f32 -1.442695, %v245_v48 }
 0x34c   :  { %v243_v49 = vpop.f32.mrf.mxu2 }
 0x34d   :  { %1019 = vpow2.f32 %v892_v51 }
 0x351   :  { %v1018_v50 = vpop.eup %1017 }
 0x352   :  { %268 = vrot.lane.b32.xlu0 %v1018_v50, %s1079_s1 }
 0x353   :  { %v1020_v52 = vpop.eup %1019 }
 0x354   :  { %v249_v53 = vadd.f32 1.0, %v1020_v52 }
 0x356   :  { %1021 = vrcp.f32 %v249_v53  ;;  %v261_v59 = vand.u32 2147483648, %v249_v53  ;;  %vm255_vm10 = vweird.f32 %v249_v53  ;;  %v259_v60 = vand.u32 2147483647, %v249_v53 }
 0x358   :  { %v262_v62 = vor.u32 1.1754944e-38, %v261_v59  ;;  %vm260_vm12 = vcmp.eq.f32.partialorder %v259_v60, 8.507059e+37 }
 0x35c   :  { %v1022_v54 = vpop.eup %1021 }
 0x35d   :  { %v251_v55 = vmul.f32 %v1022_v54, %v249_v53  ;;  %vm256_vm9 = vweird.f32 %v1022_v54 }
 0x35e   :  { %vm257_vm11 = vmor %vm255_vm10, %vm256_vm9 }
 0x35f   :  { %v252_v56 = vsub.f32 1.0, %v251_v55 }
 0x361   :  { %v253_v57 = vmul.f32 %v1022_v54, %v252_v56 }
 0x363   :  { %v254_v58 = vadd.f32 %v1022_v54, %v253_v57 }
 0x365   :  { %v258_v61 = vsel %vm257_vm11, %v1022_v54, %v254_v58 }
 0x366   :  { %v263_v0 = vsel %vm260_vm12, %v262_v62, %v258_v61 }
 0x367   :  { %v266_v2 = vmul.f32 %v263_v0, %v218_v37 }
 0x3c4   :  { %v269_v63 = vpop.permute.xlu0 %268 }
 0x3c5   :  { %v271_v1 = vmul.f32 %v269_v63, %v263_v0 }
 0x3c7   :  { %273 = vrot.lane.b32.xlu1 %v271_v1, %s1080_s18 }
 0x3cf   :  { %44 = vperm.xlu1 %1007, %v29_v6  }
 0x439   :  { %v274_v3 = vpop.permute.xlu1 %273 }
 0x43a   :  { %v276_v4 = vadd.f32 %v274_v3, %v266_v2  ;;  %v31_v2 = vld [vmem:[%s1317_s0 + $0x20] sm:$0xff] }
 0x43c   :  { %1023 = vtanh.f32 %v276_v4 }
 0x441   :  { %v45_v10 = vpop.permute.xlu1 %44 }
 0x442   :  { %v1024_v5 = vpop.eup %1023  ;;  %vm63_vm13 = vcmp.eq.s32.totalorder %v1159_v11, %v45_v10 }
 0x443   :  { %279 = vrot.lane.b32.xlu2 %v1024_v5, %s1081_s19  ;;  %v871_v12 = vsel %vm63_vm13, 1.0, %v1078_v13 }
 0x444   :  { %880 = vmatmul.msk.f32.gmra.mxu0 %vm92_vm1, %v871_v12 }
 0x49d   :  { %v280_v7 = vpop.permute.xlu2 %279 }
 0x49e   :  { %v282_v8 = vmul.f32 %v280_v7, %v263_v0 }
 0x4a0   :  { %v283_v9 = vpack.c.bf16 %v282_v8, %v282_v8 }
 0x4a2   :  { %285 = vrot.lane.b32.xlu0 %v283_v9, %s1082_s20 }
 0x4c1   :  { %v144_v15 = vpop.f32.mrf.mxu0 }
 0x514   :  { %v286_v14 = vpop.permute.xlu0 %285 }
 0x515   :  { %893 = vmatmul.msk.bf16.vlgmr.msra.gmra.mxu3 %vm170_vm7, %v286_v14 }
 0x598   :  { %v299_v16 = vpop.f32.mrf.mxu3 }
 0x599   :  { %v303_v17 = vadd.f32 %v299_v16, %v144_v15 }
 0x59b   :  { %1025 = vtanh.f32 %v303_v17  ;;  %v894_v21 = vmul.f32 -1.442695, %v303_v17 }
 0x59d   :  { %1027 = vpow2.f32 %v894_v21 }
 0x5a0   :  { %v301_v18 = vpop.f32.mrf.mxu3 }
 0x5a1   :  { %v1026_v19 = vpop.eup %1025 }
 0x5a2   :  { %326 = vrot.lane.b32.xlu2 %v1026_v19, %s1079_s1 }
 0x5a3   :  { %v1028_v22 = vpop.eup %1027 }
 0x5a4   :  { %v307_v23 = vadd.f32 1.0, %v1028_v22 }
 0x5a6   :  { %1029 = vrcp.f32 %v307_v23  ;;  %v319_v29 = vand.u32 2147483648, %v307_v23  ;;  %vm313_vm15 = vweird.f32 %v307_v23  ;;  %v317_v30 = vand.u32 2147483647, %v307_v23 }
 0x5a8   :  { %v320_v32 = vor.u32 1.1754944e-38, %v319_v29  ;;  %vm318_vm2 = vcmp.eq.f32.partialorder %v317_v30, 8.507059e+37 }
 0x5aa   :  { %47 = vperm.xlu2 %1006, %v30_v20  }
 0x5ac   :  { %v1030_v24 = vpop.eup %1029 }
 0x5ad   :  { %v309_v25 = vmul.f32 %v1030_v24, %v307_v23  ;;  %vm314_vm14 = vweird.f32 %v1030_v24 }
 0x5ae   :  { %vm315_vm0 = vmor %vm313_vm15, %vm314_vm14 }
 0x5af   :  { %v310_v26 = vsub.f32 1.0, %v309_v25 }
 0x5b1   :  { %v311_v27 = vmul.f32 %v1030_v24, %v310_v26 }
 0x5b3   :  { %v312_v28 = vadd.f32 %v1030_v24, %v311_v27 }
 0x5b5   :  { %v316_v31 = vsel %vm315_vm0, %v1030_v24, %v312_v28 }
 0x5b6   :  { %v321_v34 = vsel %vm318_vm2, %v320_v32, %v316_v31 }
 0x5b7   :  { %v324_v38 = vmul.f32 %v321_v34, %v276_v4 }
 0x5fc   :  { %v327_v33 = vpop.permute.xlu2 %326 }
 0x5fd   :  { %v329_v35 = vmul.f32 %v327_v33, %v321_v34 }
 0x5ff   :  { %331 = vrot.lane.b32.xlu0 %v329_v35, %s1080_s18  ;;  %v32_v35 = vld [vmem:[%s1317_s0 + $0x28] sm:$0xff] }
 0x604   :  { %v48_v36 = vpop.permute.xlu2 %47 }
 0x605   :  { %vm64_vm3 = vcmp.eq.s32.totalorder %v1159_v11, %v48_v36 }
 0x606   :  { %v872_v37 = vsel %vm64_vm3, 1.0, %v1078_v13 }
 0x607   :  { %881 = vmatmul.msk.f32.gmra.mxu0 %vm92_vm1, %v872_v37 }
 0x671   :  { %v332_v39 = vpop.permute.xlu0 %331 }
 0x672   :  { %v334_v40 = vadd.f32 %v332_v39, %v324_v38 }
 0x674   :  { %1031 = vtanh.f32 %v334_v40 }
 0x67a   :  { %v1032_v41 = vpop.eup %1031 }
 0x67b   :  { %337 = vrot.lane.b32.xlu1 %v1032_v41, %s1081_s19 }
 0x684   :  { %v147_v46 = vpop.f32.mrf.mxu0 }
 0x6ed   :  { %v338_v42 = vpop.permute.xlu1 %337 }
 0x6ee   :  { %v340_v43 = vmul.f32 %v338_v42, %v321_v34 }
 0x6f0   :  { %v341_v44 = vpack.c.bf16 %v340_v43, %v340_v43 }
 0x6f2   :  { %343 = vrot.lane.b32.xlu0 %v341_v44, %s1082_s20 }
 0x764   :  { %v344_v45 = vpop.permute.xlu0 %343 }
 0x765   :  { %895 = vmatmul.msk.bf16.vlgmr.msrb.gmra.mxu1 %vm170_vm7, %v344_v45 }
 0x7e2   :  { %v357_v47 = vpop.f32.mrf.mxu1 }
 0x7e3   :  { %v361_v48 = vadd.f32 %v357_v47, %v147_v46 }
 0x7e5   :  { %1033 = vtanh.f32 %v361_v48  ;;  %v896_v51 = vmul.f32 -1.442695, %v361_v48 }
 0x7e7   :  { %1035 = vpow2.f32 %v896_v51  ;;  %v33_v51 = vld [vmem:[%s1317_s0 + $0x30] sm:$0xff] }
 0x7ea   :  { %v359_v49 = vpop.f32.mrf.mxu1 }
 0x7eb   :  { %v1034_v50 = vpop.eup %1033 }
 0x7ec   :  { %384 = vrot.lane.b32.xlu1 %v1034_v50, %s1079_s1 }
 0x7ed   :  { %v1036_v52 = vpop.eup %1035 }
 0x7ee   :  { %v365_v53 = vadd.f32 1.0, %v1036_v52 }
 0x7f0   :  { %1037 = vrcp.f32 %v365_v53  ;;  %v377_v59 = vand.u32 2147483648, %v365_v53  ;;  %vm371_vm5 = vweird.f32 %v365_v53  ;;  %v375_v60 = vand.u32 2147483647, %v365_v53 }
 0x7f2   :  { %v378_v62 = vor.u32 1.1754944e-38, %v377_v59  ;;  %vm376_vm8 = vcmp.eq.f32.partialorder %v375_v60, 8.507059e+37 }
 0x7f6   :  { %v1038_v54 = vpop.eup %1037 }
 0x7f7   :  { %v367_v55 = vmul.f32 %v1038_v54, %v365_v53  ;;  %vm372_vm4 = vweird.f32 %v1038_v54 }
 0x7f8   :  { %vm373_vm6 = vmor %vm371_vm5, %vm372_vm4 }
 0x7f9   :  { %v368_v56 = vsub.f32 1.0, %v367_v55 }
 0x7fb   :  { %v369_v57 = vmul.f32 %v1038_v54, %v368_v56 }
 0x7fd   :  { %v370_v58 = vadd.f32 %v1038_v54, %v369_v57 }
 0x7ff   :  { %v374_v61 = vsel %vm373_vm6, %v1038_v54, %v370_v58 }
 0x800   :  { %v379_v0 = vsel %vm376_vm8, %v378_v62, %v374_v61 }
 0x801   :  { %v382_v3 = vmul.f32 %v379_v0, %v334_v40 }
 0x85e   :  { %v385_v63 = vpop.permute.xlu1 %384 }
 0x85f   :  { %v387_v1 = vmul.f32 %v385_v63, %v379_v0 }
 0x861   :  { %389 = vrot.lane.b32.xlu2 %v387_v1, %s1080_s18 }
 0x869   :  { %50 = vperm.xlu2 %1006, %v31_v2  }
 0x8bb   :  { %v390_v4 = vpop.permute.xlu2 %389 }
 0x8bc   :  { %v392_v5 = vadd.f32 %v390_v4, %v382_v3 }
 0x8be   :  { %1039 = vtanh.f32 %v392_v5 }
 0x8c3   :  { %v51_v6 = vpop.permute.xlu2 %50 }
 0x8c4   :  { %v1040_v7 = vpop.eup %1039  ;;  %vm65_vm9 = vcmp.eq.s32.totalorder %v1159_v11, %v51_v6 }
 0x8c5   :  { %v873_v8 = vsel %vm65_vm9, 1.0, %v1078_v13  ;;  %395 = vrot.lane.b32.xlu0 %v1040_v7, %s1081_s19 }
 0x8c6   :  { %882 = vmatmul.msk.f32.gmra.mxu0 %vm92_vm1, %v873_v8 }
 0x937   :  { %v396_v9 = vpop.permute.xlu0 %395 }
 0x938   :  { %v398_v10 = vmul.f32 %v396_v9, %v379_v0 }
 0x93a   :  { %v399_v12 = vpack.c.bf16 %v398_v10, %v398_v10 }
 0x93c   :  { %401 = vrot.lane.b32.xlu1 %v399_v12, %s1082_s20 }
 0x943   :  { %v150_v15 = vpop.f32.mrf.mxu0 }
 0x9ae   :  { %v402_v14 = vpop.permute.xlu1 %401 }
 0x9af   :  { %897 = vmatmul.msk.bf16.vlgmr.msrb.gmra.mxu2 %vm170_vm7, %v402_v14 }
 0xa32   :  { %v415_v16 = vpop.f32.mrf.mxu2 }
 0xa33   :  { %v419_v17 = vadd.f32 %v415_v16, %v150_v15 }
 0xa35   :  { %1041 = vtanh.f32 %v419_v17  ;;  %v898_v20 = vmul.f32 -1.442695, %v419_v17 }
 0xa37   :  { %1043 = vpow2.f32 %v898_v20 }
 0xa3a   :  { %v417_v18 = vpop.f32.mrf.mxu2 }
 0xa3b   :  { %v1042_v19 = vpop.eup %1041 }
 0xa3c   :  { %442 = vrot.lane.b32.xlu0 %v1042_v19, %s1079_s1 }
 0xa3d   :  { %v1044_v21 = vpop.eup %1043 }
 0xa3e   :  { %v423_v22 = vadd.f32 1.0, %v1044_v21 }
 0xa40   :  { %1045 = vrcp.f32 %v423_v22  ;;  %v435_v28 = vand.u32 2147483648, %v423_v22  ;;  %vm429_vm11 = vweird.f32 %v423_v22  ;;  %v433_v29 = vand.u32 2147483647, %v423_v22 }
 0xa42   :  { %v436_v31 = vor.u32 1.1754944e-38, %v435_v28  ;;  %vm434_vm13 = vcmp.eq.f32.partialorder %v433_v29, 8.507059e+37 }
 0xa46   :  { %v1046_v23 = vpop.eup %1045 }
 0xa47   :  { %v425_v24 = vmul.f32 %v1046_v23, %v423_v22  ;;  %vm430_vm10 = vweird.f32 %v1046_v23 }
 0xa48   :  { %vm431_vm12 = vmor %vm429_vm11, %vm430_vm10 }
 0xa49   :  { %v426_v25 = vsub.f32 1.0, %v425_v24 }
 0xa4b   :  { %v427_v26 = vmul.f32 %v1046_v23, %v426_v25 }
 0xa4d   :  { %v428_v27 = vadd.f32 %v1046_v23, %v427_v26 }
 0xa4f   :  { %v432_v30 = vsel %vm431_vm12, %v1046_v23, %v428_v27 }
 0xa50   :  { %v437_v33 = vsel %vm434_vm13, %v436_v31, %v432_v30 }
 0xa51   :  { %v440_v36 = vmul.f32 %v437_v33, %v392_v5 }
 0xaae   :  { %v443_v32 = vpop.permute.xlu0 %442 }
 0xaaf   :  { %v445_v34 = vmul.f32 %v443_v32, %v437_v33 }
 0xab1   :  { %447 = vrot.lane.b32.xlu1 %v445_v34, %s1080_s18 }
 0xab9   :  { %53 = vperm.xlu1 %1007, %v32_v35   ;;  %v34_v35 = vld [vmem:[%s1317_s0 + $0x38] sm:$0xff] }
 0xb23   :  { %v448_v37 = vpop.permute.xlu1 %447 }
 0xb24   :  { %v450_v38 = vadd.f32 %v448_v37, %v440_v36 }
 0xb26   :  { %1047 = vtanh.f32 %v450_v38 }
 0xb2b   :  { %v54_v39 = vpop.permute.xlu1 %53 }
 0xb2c   :  { %v1048_v40 = vpop.eup %1047  ;;  %vm66_vm14 = vcmp.eq.s32.totalorder %v1159_v11, %v54_v39 }
 0xb2d   :  { %v874_v41 = vsel %vm66_vm14, 1.0, %v1078_v13  ;;  %453 = vrot.lane.b32.xlu2 %v1048_v40, %s1081_s19 }
 0xb2e   :  { %883 = vmatmul.msk.f32.gmra.mxu0 %vm92_vm1, %v874_v41 }
 0xb87   :  { %v454_v42 = vpop.permute.xlu2 %453 }
 0xb88   :  { %v456_v43 = vmul.f32 %v454_v42, %v437_v33 }
 0xb8a   :  { %v457_v44 = vpack.c.bf16 %v456_v43, %v456_v43 }
 0xb8c   :  { %459 = vrot.lane.b32.xlu0 %v457_v44, %s1082_s20 }
 0xbab   :  { %v153_v46 = vpop.f32.mrf.mxu0 }
 0xbfe   :  { %v460_v45 = vpop.permute.xlu0 %459 }
 0xbff   :  { %899 = vmatmul.msk.bf16.vlgmr.msrb.gmra.mxu3 %vm170_vm7, %v460_v45 }
 0xc82   :  { %v473_v47 = vpop.f32.mrf.mxu3 }
 0xc83   :  { %v477_v48 = vadd.f32 %v473_v47, %v153_v46 }
 0xc85   :  { %1049 = vtanh.f32 %v477_v48  ;;  %v900_v52 = vmul.f32 -1.442695, %v477_v48 }
 0xc87   :  { %1051 = vpow2.f32 %v900_v52 }
 0xc8a   :  { %v475_v49 = vpop.f32.mrf.mxu3 }
 0xc8b   :  { %v1050_v50 = vpop.eup %1049 }
 0xc8c   :  { %500 = vrot.lane.b32.xlu2 %v1050_v50, %s1079_s1 }
 0xc8d   :  { %v1052_v53 = vpop.eup %1051 }
 0xc8e   :  { %v481_v54 = vadd.f32 1.0, %v1052_v53 }
 0xc90   :  { %1053 = vrcp.f32 %v481_v54  ;;  %v493_v60 = vand.u32 2147483648, %v481_v54  ;;  %vm487_vm0 = vweird.f32 %v481_v54  ;;  %v491_v61 = vand.u32 2147483647, %v481_v54 }
 0xc92   :  { %v494_v63 = vor.u32 1.1754944e-38, %v493_v60  ;;  %vm492_vm3 = vcmp.eq.f32.partialorder %v491_v61, 8.507059e+37 }
 0xc94   :  { %56 = vperm.xlu2 %1006, %v33_v51  }
 0xc96   :  { %v1054_v55 = vpop.eup %1053 }
 0xc97   :  { %v483_v56 = vmul.f32 %v1054_v55, %v481_v54  ;;  %vm488_vm15 = vweird.f32 %v1054_v55 }
 0xc98   :  { %vm489_vm2 = vmor %vm487_vm0, %vm488_vm15  ;;  %vm863_vm0 = vcmask 15360  }
 0xc99   :  { %v484_v57 = vsub.f32 1.0, %v483_v56 }
 0xc9b   :  { %v485_v58 = vmul.f32 %v1054_v55, %v484_v57 }
 0xc9d   :  { %v486_v59 = vadd.f32 %v1054_v55, %v485_v58 }
 0xc9f   :  { %v490_v62 = vsel %vm489_vm2, %v1054_v55, %v486_v59 }
 0xca0   :  { %v495_v1 = vsel %vm492_vm3, %v494_v63, %v490_v62 }
 0xca1   :  { %v498_v5 = vmul.f32 %v495_v1, %v450_v38 }
 0xce6   :  { %v501_v0 = vpop.permute.xlu2 %500 }
 0xce7   :  { %v503_v2 = vmul.f32 %v501_v0, %v495_v1 }
 0xce9   :  { %505 = vrot.lane.b32.xlu0 %v503_v2, %s1080_s18 }
 0xcee   :  { %v57_v3 = vpop.permute.xlu2 %56 }
 0xcef   :  { %vm67_vm4 = vcmp.eq.s32.totalorder %v1159_v11, %v57_v3 }
 0xcf0   :  { %v875_v4 = vsel %vm67_vm4, 1.0, %v1078_v13 }
 0xcf1   :  { %884 = vmatmul.msk.f32.gmra.mxu0 %vm92_vm1, %v875_v4  ;;  %v907_v4 = vld [vmem:[%s1320_s3] sm:$0xf] }
 0xd5b   :  { %v506_v6 = vpop.permute.xlu0 %505 }
 0xd5c   :  { %v508_v7 = vadd.f32 %v506_v6, %v498_v5  ;;  %v982_v5 = vld [vmem:[%s1320_s3 + $0x4] sm:$0xf0]  ;;  %v981_v6 = vld [vmem:[%s1320_s3 + $0x4] sm:$0xf] }
 0xd5e   :  { %1055 = vtanh.f32 %v508_v7 }
 0xd64   :  { %v1056_v8 = vpop.eup %1055 }
 0xd65   :  { %511 = vrot.lane.b32.xlu1 %v1056_v8, %s1081_s19  ;;  %v909_v8 = vld [vmem:[%s1320_s3 + $0x8] sm:$0xf0] }
 0xd6e   :  { %v156_v15 = vpop.f32.mrf.mxu0 }
 0xdd7   :  { %v512_v9 = vpop.permute.xlu1 %511 }
 0xdd8   :  { %v514_v10 = vmul.f32 %v512_v9, %v495_v1  ;;  %v912_v9 = vor.u32 %v981_v6, %v909_v8 }
 0xdda   :  { %v515_v12 = vpack.c.bf16 %v514_v10, %v514_v10  ;;  %676 = vmatpush.bf16.msrb.mxu1 %v912_v9 }
 0xddc   :  { %517 = vrot.lane.b32.xlu0 %v515_v12, %s1082_s20 }
 0xe4e   :  { %v518_v14 = vpop.permute.xlu0 %517 }
 0xe4f   :  { %901 = vmatmul.msk.bf16.vlgmr.msra.gmra.mxu1 %vm170_vm7, %v518_v14 }
 0xecc   :  { %v531_v16 = vpop.f32.mrf.mxu1 }
 0xecd   :  { %v535_v17 = vadd.f32 %v531_v16, %v156_v15  ;;  %v998_v15 = vld [vmem:[%s1321_s5 + $0x78] sm:$0xff] }
 0xece   :  { %v990_v16 = vld [vmem:[%s1321_s5 + $0x38] sm:$0xff] }
 0xecf   :  { %1057 = vtanh.f32 %v535_v17  ;;  %v902_v20 = vmul.f32 -1.442695, %v535_v17  ;;  %v997_v17 = vld [vmem:[%s1321_s5 + $0x70] sm:$0xff]  ;;  %818 = vmatpush.bf16.msrb.mxu2 %v990_v16 }
 0xed1   :  { %1059 = vpow2.f32 %v902_v20  ;;  %v988_v20 = vld [vmem:[%s1321_s5 + $0x28] sm:$0xff] }
 0xed4   :  { %v533_v18 = vpop.f32.mrf.mxu1 }
 0xed5   :  { %v1058_v19 = vpop.eup %1057  ;;  %v989_v18 = vld [vmem:[%s1321_s5 + $0x30] sm:$0xff] }
 0xed6   :  { %558 = vrot.lane.b32.xlu1 %v1058_v19, %s1079_s1  ;;  %v996_v19 = vld [vmem:[%s1321_s5 + $0x68] sm:$0xff]  ;;  %819 = vmatpush.bf16.msrb.mxu2 %v989_v18 }
 0xed7   :  { %v1060_v21 = vpop.eup %1059 }
 0xed8   :  { %v539_v22 = vadd.f32 1.0, %v1060_v21  ;;  %v995_v21 = vld [vmem:[%s1321_s5 + $0x60] sm:$0xff] }
 0xeda   :  { %1061 = vrcp.f32 %v539_v22  ;;  %v551_v28 = vand.u32 2147483648, %v539_v22  ;;  %vm545_vm6 = vweird.f32 %v539_v22  ;;  %v549_v29 = vand.u32 2147483647, %v539_v22  ;;  %820 = vmatpush.bf16.msrb.mxu2 %v988_v20 }
 0xedc   :  { %v552_v31 = vor.u32 1.1754944e-38, %v551_v28  ;;  %vm550_vm9 = vcmp.eq.f32.partialorder %v549_v29, 8.507059e+37  ;;  %v985_v28 = vld [vmem:[%s1321_s5 + $0x10] sm:$0xff]  ;;  %v991_v29 = vld [vmem:[%s1321_s5 + $0x40] sm:$0xff] }
 0xee0   :  { %v1062_v23 = vpop.eup %1061 }
 0xee1   :  { %v541_v24 = vmul.f32 %v1062_v23, %v539_v22  ;;  %vm546_vm5 = vweird.f32 %v1062_v23  ;;  %v987_v22 = vld [vmem:[%s1321_s5 + $0x20] sm:$0xff] }
 0xee2   :  { %vm547_vm8 = vmor %vm545_vm6, %vm546_vm5  ;;  %821 = vmatpush.bf16.msrb.mxu2 %v987_v22 }
 0xee3   :  { %v542_v25 = vsub.f32 1.0, %v541_v24  ;;  %v986_v24 = vld [vmem:[%s1321_s5 + $0x18] sm:$0xff] }
 0xee5   :  { %v543_v26 = vmul.f32 %v1062_v23, %v542_v25  ;;  %v993_v25 = vld [vmem:[%s1321_s5 + $0x50] sm:$0xff] }
 0xee6   :  { %822 = vmatpush.bf16.msrb.mxu2 %v986_v24 }
 0xee7   :  { %v544_v27 = vadd.f32 %v1062_v23, %v543_v26 }
 0xee9   :  { %v548_v30 = vsel %vm547_vm8, %v1062_v23, %v544_v27  ;;  %v994_v23 = vld [vmem:[%s1321_s5 + $0x58] sm:$0xff]  ;;  %v992_v27 = vld [vmem:[%s1321_s5 + $0x48] sm:$0xff] }
 0xeea   :  { %v553_v33 = vsel %vm550_vm9, %v552_v31, %v548_v30  ;;  %823 = vmatpush.bf16.msrb.mxu2 %v985_v28  ;;  %v984_v30 = vld [vmem:[%s1321_s5 + $0x8] sm:$0xff]  ;;  %v983_v31 = vld [vmem:[%s1321_s5] sm:$0xff] }
 0xeeb   :  { %v556_v36 = vmul.f32 %v553_v33, %v508_v7  ;;  %v908_v7 = vor.u32 %v982_v5, %v907_v4 }
 0xeed   :  { %663 = vmatpush.bf16.msra.mxu3 %v908_v7 }
 0xeee   :  { %824 = vmatpush.bf16.msrb.mxu2 %v984_v30 }
 0xef1   :  { %831 = vmatpush.bf16.msrb.mxu3 %v998_v15 }
 0xef2   :  { %825 = vmatpush.bf16.msrb.mxu2 %v983_v31 }
 0xef5   :  { %832 = vmatpush.bf16.msrb.mxu3 %v997_v17 }
 0xef9   :  { %833 = vmatpush.bf16.msrb.mxu3 %v996_v19 }
 0xefd   :  { %834 = vmatpush.bf16.msrb.mxu3 %v995_v21 }
 0xf01   :  { %835 = vmatpush.bf16.msrb.mxu3 %v994_v23 }
 0xf05   :  { %836 = vmatpush.bf16.msrb.mxu3 %v993_v25 }
 0xf09   :  { %837 = vmatpush.bf16.msrb.mxu3 %v992_v27 }
 0xf0d   :  { %838 = vmatpush.bf16.msrb.mxu3 %v991_v29 }
 0xf48   :  { %v559_v32 = vpop.permute.xlu1 %558 }
 0xf49   :  { %v561_v34 = vmul.f32 %v559_v32, %v553_v33  ;;  %v634_v32 = vld [vmem:[%s1322_s4] sm:$0x3] }
 0xf4b   :  { %563 = vrot.lane.b32.xlu2 %v561_v34, %s1080_s18 }
 0xf53   :  { %59 = vperm.xlu2 %1006, %v34_v35  }
 0xfa5   :  { %v564_v37 = vpop.permute.xlu2 %563 }
 0xfa6   :  { %v566_v38 = vadd.f32 %v564_v37, %v556_v36  ;;  %v636_v37 = vperm.slane %v634_v32, 0 }
 0xfa8   :  { %1063 = vtanh.f32 %v566_v38 }
 0xfad   :  { %v60_v39 = vpop.permute.xlu2 %59 }
 0xfae   :  { %v1064_v40 = vpop.eup %1063  ;;  %vm68_vm10 = vcmp.eq.s32.totalorder %v1159_v11, %v60_v39 }
 0xfaf   :  { %v876_v41 = vsel %vm68_vm10, 1.0, %v1078_v13  ;;  %569 = vrot.lane.b32.xlu0 %v1064_v40, %s1081_s19 }
 0xfb0   :  { %885 = vmatmul.msk.f32.gmra.mxu0 %vm92_vm1, %v876_v41 }
0x1021   :  { %v570_v42 = vpop.permute.xlu0 %569 }
0x1022   :  { %v572_v43 = vmul.f32 %v570_v42, %v553_v33  ;;  %v637_v33 = vperm.slane %v634_v32, 1 }
0x1024   :  { %v573_v44 = vpack.c.bf16 %v572_v43, %v572_v43 }
0x1026   :  { %575 = vrot.lane.b32.xlu1 %v573_v44, %s1082_s20 }
0x102d   :  { %v159_v46 = vpop.f32.mrf.mxu0 }
0x1098   :  { %v576_v45 = vpop.permute.xlu1 %575 }
0x1099   :  { %903 = vmatmul.msk.bf16.vlgmr.msra.gmra.mxu2 %vm170_vm7, %v576_v45 }
0x111c   :  { %v589_v47 = vpop.f32.mrf.mxu2 }
0x111d   :  { %v593_v48 = vadd.f32 %v589_v47, %v159_v46  ;;  %v1008_v46 = vld [vmem:[%s1323_s6] ss:$0 sm:$0xff] }
0x111f   :  { %1065 = vtanh.f32 %v593_v48  ;;  %v904_v13 = vmul.f32 -1.442695, %v593_v48 }
0x1121   :  { %1067 = vpow2.f32 %v904_v13 }
0x1124   :  { %v591_v49 = vpop.f32.mrf.mxu2 }
0x1125   :  { %v1066_v11 = vpop.eup %1065 }
0x1126   :  { %616 = vrot.lane.b32.xlu0 %v1066_v11, %s1079_s1 }
0x1127   :  { %v1068_v50 = vpop.eup %1067 }
0x1128   :  { %v597_v51 = vadd.f32 1.0, %v1068_v50 }
0x112a   :  { %1069 = vrcp.f32 %v597_v51  ;;  %v609_v57 = vand.u32 2147483648, %v597_v51  ;;  %vm603_vm11 = vweird.f32 %v597_v51  ;;  %v607_v58 = vand.u32 2147483647, %v597_v51 }
0x112c   :  { %v610_v60 = vor.u32 1.1754944e-38, %v609_v57  ;;  %vm608_vm13 = vcmp.eq.f32.partialorder %v607_v58, 8.507059e+37 }
0x1130   :  { %v1070_v52 = vpop.eup %1069 }
0x1131   :  { %v599_v53 = vmul.f32 %v1070_v52, %v597_v51  ;;  %vm604_vm1 = vweird.f32 %v1070_v52 }
0x1132   :  { %vm605_vm12 = vmor %vm603_vm11, %vm604_vm1 }
0x1133   :  { %v600_v54 = vsub.f32 1.0, %v599_v53 }
0x1135   :  { %v601_v55 = vmul.f32 %v1070_v52, %v600_v54 }
0x1137   :  { %v602_v56 = vadd.f32 %v1070_v52, %v601_v55 }
0x1139   :  { %v606_v59 = vsel %vm605_vm12, %v1070_v52, %v602_v56 }
0x113a   :  { %v611_v62 = vsel %vm608_vm13, %v610_v60, %v606_v59 }
0x113b   :  { %v614_v0 = vmul.f32 %v611_v62, %v566_v38 }
0x1198   :  { %v617_v61 = vpop.permute.xlu0 %616 }
0x1199   :  { %v619_v63 = vmul.f32 %v617_v61, %v611_v62 }
0x119b   :  { %621 = vrot.lane.b32.xlu1 %v619_v63, %s1080_s18 }
0x120d   :  { %v622_v1 = vpop.permute.xlu1 %621 }
0x120e   :  { %v624_v2 = vadd.f32 %v622_v1, %v614_v0 }
0x1210   :  { %1071 = vtanh.f32 %v624_v2 }
0x1216   :  { %v1072_v3 = vpop.eup %1071 }
0x1217   :  { %627 = vrot.lane.b32.xlu2 %v1072_v3, %s1081_s19 }
0x1271   :  { %v628_v10 = vpop.permute.xlu2 %627 }
0x1272   :  { %v630_v12 = vmul.f32 %v628_v10, %v611_v62 }
0x1274   :  { %v631_v14 = vpack.c.bf16 %v630_v12, %v630_v12 }
0x1276   :  { %641 = vrot.lane.b32.xlu0 %v631_v14, %s1082_s20 }
0x12e8   :  { %v642_v26 = vpop.permute.xlu0 %641 }
0x12e9   :  { %913 = vmatmul.msk.bf16.vlgmr.msra.gmra.mxu3 %vm170_vm7, %v642_v26  ;;  %914 = vmatmul.msk.bf16.vlgmr.msrb.gmra.mxu1 %vm170_vm7, %v642_v26 }
0x1366   :  { %v678_v34 = vpop.f32.mrf.mxu1 }
0x1367   :  { %v679_v35 = vadd.f32 %v678_v34, %v637_v33 }
0x1369   :  { %v683_v36 = vmax.f32 %v679_v35, 0.0 }
0x136b   :  { %v685_v38 = vpack.c.bf16 %v683_v36, %v683_v36 }
0x136c   :  { %v665_v39 = vpop.f32.mrf.mxu3 }
0x136d   :  { %v666_v40 = vadd.f32 %v665_v39, %v636_v37  ;;  %839 = vmatmul.bf16.vlgmr.msrb.gmra.mxu3 %v685_v38 }
0x136e   :  { %v680_v41 = vpop.f32.mrf.mxu1 }
0x136f   :  { %v682_v42 = vmax.f32 %v666_v40, 0.0 }
0x1371   :  { %v684_v43 = vpack.c.bf16 %v682_v42, %v682_v42 }
0x1373   :  { %826 = vmatmul.bf16.vlgmr.msrb.gmra.mxu2 %v684_v43 }
0x1374   :  { %v667_v44 = vpop.f32.mrf.mxu3 }
0x13f0   :  { %v840_v45 = vpop.f32.mrf.mxu3 }
0x13f6   :  { %v827_v47 = vpop.f32.mrf.mxu2 }
0x13f7   :  { %v828_v48 = vadd.f32 %v1008_v46, %v827_v47 }
0x13f8   :  { %v842_v49 = vpop.f32.mrf.mxu3 }
0x13f9   :  { %v841_v11 = vadd.f32 %v840_v45, %v828_v48 }
0x13fb   :  { %v979_v13 = vmul.f32 -1.442695, %v841_v11 }
0x13fd   :  { %1073 = vpow2.f32 %v979_v13 }
0x13fe   :  { %v829_v50 = vpop.f32.mrf.mxu2 }
0x1403   :  { %v1074_v51 = vpop.eup %1073 }
0x1404   :  { %v847_v52 = vadd.f32 1.0, %v1074_v51 }
0x1406   :  { %1075 = vrcp.f32 %v847_v52  ;;  %v859_v56 = vand.u32 2147483648, %v847_v52  ;;  %v857_v58 = vand.u32 2147483647, %v847_v52  ;;  %vm853_vm14 = vweird.f32 %v847_v52 }
0x1408   :  { %v860_v60 = vor.u32 1.1754944e-38, %v859_v56  ;;  %vm858_vm2 = vcmp.eq.f32.partialorder %v857_v58, 8.507059e+37 }
0x140c   :  { %v1076_v53 = vpop.eup %1075 }
0x140d   :  { %v849_v54 = vmul.f32 %v1076_v53, %v847_v52  ;;  %vm854_vm7 = vweird.f32 %v1076_v53 }
0x140e   :  { %vm855_vm15 = vmor %vm853_vm14, %vm854_vm7 }
0x140f   :  { %v850_v55 = vsub.f32 1.0, %v849_v54 }
0x1411   :  { %v851_v57 = vmul.f32 %v1076_v53, %v850_v55 }
0x1413   :  { %v852_v59 = vadd.f32 %v1076_v53, %v851_v57 }
0x1415   :  { %v856_v61 = vsel %vm855_vm15, %v1076_v53, %v852_v59 }
0x1416   :  { %v861_v62 = vsel %vm858_vm2, %v860_v60, %v856_v61 }
0x1417   :  { %864 = vst.msk [vmem:[%s1324_s7] sm:$0xff] %vm863_vm0, %v861_v62 }

</bundles_post_ra>
